<compile_context>
chip_gen: v7x
topology: tpu7x:2x2x1
jax: 0.10.0
libtpu: 0.0.40
codegen_flags: <defaults>
</compile_context>

<pallas_src>
import jax
import jax.numpy as jnp
from jax.experimental import pallas as pl
from jax.experimental.pallas import tpu as pltpu

HIDDEN = 256   # nn.Linear(input_dim, 256)
LANE = 128


def _round_up(n, m):
    return ((n + m - 1) // m) * m


def mlp_kernel(x_ref, w1_ref, b1_ref, w2_ref, b2_ref, o_ref):
    # Layer 1: bf16 MXU matmul, f32 accumulation, f32 bias + tanh.
    x = x_ref[...].astype(jnp.bfloat16)
    h = jnp.dot(x, w1_ref[...], preferred_element_type=jnp.float32)
    h = jnp.tanh(h + b1_ref[...])
    # Layer 2: cast the hidden activation back to bf16 for the MXU.
    y = jnp.dot(h.astype(jnp.bfloat16), w2_ref[...],
                preferred_element_type=jnp.float32)
    y = jnp.tanh(y + b2_ref[...])
    # NOTE: at large batch the two tanh calls land on the single EUP slot; if
    # exact torch.tanh matching were not required, a VPU rational approx for
    # the 256-wide hidden tanh would remove that ceiling.
    o_ref[...] = y.astype(o_ref.dtype)


def nonlinear_regression_forward(x, w1, b1, w2, b2, block_b=None):
    """x: (B, D_in); w1: (D_in, 256); b1: (1, 256); w2: (256, D_out); b2: (1, D_out)."""
    B, D_in = x.shape
    D_out = w2.shape[1]

    # Lane-dense output: pad output feature dim to a multiple of 128 so the
    # final store is an unmasked full-lane vst; pad columns are all-zero
    # weights/bias (tanh(0) = 0) and are sliced off outside the kernel.
    D_pad = _round_up(D_out, LANE)
    if D_pad != D_out:
        w2p = jnp.pad(w2, ((0, 0), (0, D_pad - D_out)))
        b2p = jnp.pad(b2, ((0, 0), (0, D_pad - D_out)))
    else:
        w2p, b2p = w2, b2

    # Cast weights once to bf16 (halves HBM traffic, MXU-native); keep biases f32.
    w1b = w1.astype(jnp.bfloat16)
    w2b = w2p.astype(jnp.bfloat16)
    b1f = b1.astype(jnp.float32)
    b2f = b2p.astype(jnp.float32)

    # Batch tile: multiple of 8 sublanes; cap at 1024 rows so
    # 2x(x tile) + 2x(out tile) + resident weights + (TB,256) f32 intermediate
    # fit comfortably within v7x's scoped VMEM while still hiding DMA.
    if block_b is None:
        block_b = min(1024, _round_up(B, 8))
    grid = (pl.cdiv(B, block_b),)

    itemsize = jnp.dtype(x.dtype).itemsize
    cost = pl.CostEstimate(
        flops=2 * B * (D_in * HIDDEN + HIDDEN * D_out),
        transcendentals=B * (HIDDEN + D_out),
        bytes_accessed=(x.size * itemsize
                        + w1b.size * 2 + w2b.size * 2
                        + b1f.size * 4 + b2f.size * 4
                        + B * D_pad * itemsize),
    )

    out_padded = pl.pallas_call(
        mlp_kernel,
        out_shape=jax.ShapeDtypeStruct((B, D_pad), x.dtype),
        grid=grid,
        in_specs=[
            pl.BlockSpec((block_b, D_in), lambda i: (i, 0)),   # x: streamed per tile
            pl.BlockSpec((D_in, HIDDEN), lambda i: (0, 0)),    # w1: VMEM-resident
            pl.BlockSpec((1, HIDDEN), lambda i: (0, 0)),       # b1: VMEM-resident
            pl.BlockSpec((HIDDEN, D_pad), lambda i: (0, 0)),   # w2: VMEM-resident
            pl.BlockSpec((1, D_pad), lambda i: (0, 0)),        # b2: VMEM-resident
        ],
        out_specs=pl.BlockSpec((block_b, D_pad), lambda i: (i, 0)),
        compiler_params=pltpu.CompilerParams(
            dimension_semantics=("parallel",)),
        cost_estimate=cost,
    )(x, w1b, b1f, w2b, b2f)

    return out_padded[:, :D_out]


def init_params(key, input_dim, output_dim, dtype=jnp.float32):
    """Deterministic init mirroring nn.Linear's U(-1/sqrt(fan_in), 1/sqrt(fan_in))."""
    k1, k2, k3, k4 = jax.random.split(key, 4)
    bound1 = 1.0 / jnp.sqrt(input_dim)
    bound2 = 1.0 / jnp.sqrt(HIDDEN)
    # Stored pre-transposed: (in_features, out_features)
    w1 = jax.random.uniform(k1, (input_dim, HIDDEN), dtype, -bound1, bound1)
    b1 = jax.random.uniform(k2, (1, HIDDEN), dtype, -bound1, bound1)
    w2 = jax.random.uniform(k3, (HIDDEN, output_dim), dtype, -bound2, bound2)
    b2 = jax.random.uniform(k4, (1, output_dim), dtype, -bound2, bound2)
    return w1, b1, w2, b2


if __name__ == "__main__":
    key = jax.random.PRNGKey(0)
    kx, kp = jax.random.split(key)

    batch = 8
    input_dim = 32
    output_dim = 16

    x = jax.random.normal(kx, (batch, input_dim), jnp.float32)
    w1, b1, w2, b2 = init_params(kp, input_dim, output_dim)

    out = nonlinear_regression_forward(x, w1, b1, w2, b2)
    out = jax.block_until_ready(out)

    # Reference check against plain f32 JAX (tolerance loosened for bf16 matmul inputs).
    ref = jnp.tanh(jnp.tanh(x @ w1 + b1) @ w2 + b2)
    assert out.shape == (batch, output_dim)
    assert jnp.allclose(out, ref, atol=2e-2, rtol=2e-2), float(jnp.max(jnp.abs(out - ref)))

    print("KERNEL_OK")
</pallas_src>

<mosaic_0001>
module attributes {stable_mosaic.version = 11 : i64} {
  func.func @mlp_kernel(%arg0: i32, %arg1: memref<8x32xf32, #tpu.memory_space<vmem>>, %arg2: memref<32x256xbf16, #tpu.memory_space<vmem>>, %arg3: memref<1x256xf32, #tpu.memory_space<vmem>>, %arg4: memref<256x128xbf16, #tpu.memory_space<vmem>>, %arg5: memref<1x128xf32, #tpu.memory_space<vmem>>, %arg6: memref<8x128xf32, #tpu.memory_space<vmem>>) attributes {dimension_semantics = [#tpu.dimension_semantics<parallel>], iteration_bounds = array<i64: 1>, scalar_prefetch = 0 : i64, scratch_operands = 0 : i64, tpu.core_type = #tpu.core_type<tc>, window_params = [{transform_indices = @transform_0, window_bounds = array<i64: 8, 32>}, {pipeline_mode = #tpu.pipeline_mode<synchronous>, transform_indices = @transform_1, window_bounds = array<i64: 32, 256>}, {pipeline_mode = #tpu.pipeline_mode<synchronous>, transform_indices = @transform_2, window_bounds = array<i64: 1, 256>}, {pipeline_mode = #tpu.pipeline_mode<synchronous>, transform_indices = @transform_3, window_bounds = array<i64: 256, 128>}, {pipeline_mode = #tpu.pipeline_mode<synchronous>, transform_indices = @transform_4, window_bounds = array<i64: 1, 128>}, {transform_indices = @transform_5, window_bounds = array<i64: 8, 128>}]} {
    %c0 = arith.constant 0 : index
    %c0_0 = arith.constant 0 : index
    %0 = vector.load %arg1[%c0, %c0_0] : memref<8x32xf32, #tpu.memory_space<vmem>>, vector<8x32xf32>
    %1 = arith.truncf %0 : vector<8x32xf32> to vector<8x32xbf16>
    %c0_1 = arith.constant 0 : index
    %c0_2 = arith.constant 0 : index
    %2 = vector.load %arg2[%c0_1, %c0_2] : memref<32x256xbf16, #tpu.memory_space<vmem>>, vector<32x256xbf16>
    %cst = arith.constant dense<0.000000e+00> : vector<8x256xf32>
    %3 = tpu.matmul %1, %2, %cst {dimension_numbers = #tpu.dot_dimension_numbers<[1], [0], [0], [1], [0, 0, 1, 1], [], []>} : vector<8x32xbf16>, vector<32x256xbf16>, vector<8x256xf32> -> vector<8x256xf32>
    %c0_3 = arith.constant 0 : index
    %c0_4 = arith.constant 0 : index
    %4 = vector.load %arg3[%c0_3, %c0_4] : memref<1x256xf32, #tpu.memory_space<vmem>>, vector<1x256xf32>
    %5 = vector.broadcast %4 : vector<1x256xf32> to vector<8x256xf32>
    %6 = arith.addf %3, %5 : vector<8x256xf32>
    %7 = math.tanh %6 : vector<8x256xf32>
    %8 = arith.truncf %7 : vector<8x256xf32> to vector<8x256xbf16>
    %c0_5 = arith.constant 0 : index
    %c0_6 = arith.constant 0 : index
    %9 = vector.load %arg4[%c0_5, %c0_6] : memref<256x128xbf16, #tpu.memory_space<vmem>>, vector<256x128xbf16>
    %cst_7 = arith.constant dense<0.000000e+00> : vector<8x128xf32>
    %10 = tpu.matmul %8, %9, %cst_7 {dimension_numbers = #tpu.dot_dimension_numbers<[1], [0], [0], [1], [0, 0, 1, 1], [], []>} : vector<8x256xbf16>, vector<256x128xbf16>, vector<8x128xf32> -> vector<8x128xf32>
    %c0_8 = arith.constant 0 : index
    %c0_9 = arith.constant 0 : index
    %11 = vector.load %arg5[%c0_8, %c0_9] : memref<1x128xf32, #tpu.memory_space<vmem>>, vector<1x128xf32>
    %12 = vector.broadcast %11 : vector<1x128xf32> to vector<8x128xf32>
    %13 = arith.addf %10, %12 : vector<8x128xf32>
    %14 = math.tanh %13 : vector<8x128xf32>
    %c0_10 = arith.constant 0 : index
    %c0_11 = arith.constant 0 : index
    %15 = vector.load %arg6[%c0_10, %c0_11] : memref<8x128xf32, #tpu.memory_space<vmem>>, vector<8x128xf32>
    tpu.vector_store %arg6[%c0_10, %c0_11], %14 {strides = array<i32>} : memref<8x128xf32, #tpu.memory_space<vmem>>, vector<8x128xf32>,
    return
  }
  func.func @transform_0(%arg0: i32) -> (i32, i32) {
    %c0_i32 = arith.constant 0 : i32
    %c0_i32_0 = arith.constant 0 : i32
    return %arg0, %c0_i32 : i32, i32
  }
  func.func @transform_1(%arg0: i32) -> (i32, i32) {
    %c0_i32 = arith.constant 0 : i32
    %c0_i32_0 = arith.constant 0 : i32
    %c0_i32_1 = arith.constant 0 : i32
    return %c0_i32, %c0_i32_0 : i32, i32
  }
  func.func @transform_2(%arg0: i32) -> (i32, i32) {
    %c0_i32 = arith.constant 0 : i32
    %c0_i32_0 = arith.constant 0 : i32
    %c0_i32_1 = arith.constant 0 : i32
    return %c0_i32, %c0_i32_0 : i32, i32
  }
  func.func @transform_3(%arg0: i32) -> (i32, i32) {
    %c0_i32 = arith.constant 0 : i32
    %c0_i32_0 = arith.constant 0 : i32
    %c0_i32_1 = arith.constant 0 : i32
    return %c0_i32, %c0_i32_0 : i32, i32
  }
  func.func @transform_4(%arg0: i32) -> (i32, i32) {
    %c0_i32 = arith.constant 0 : i32
    %c0_i32_0 = arith.constant 0 : i32
    %c0_i32_1 = arith.constant 0 : i32
    return %c0_i32, %c0_i32_0 : i32, i32
  }
  func.func @transform_5(%arg0: i32) -> (i32, i32) {
    %c0_i32 = arith.constant 0 : i32
    %c0_i32_0 = arith.constant 0 : i32
    return %arg0, %c0_i32 : i32, i32
  }
}

</mosaic_0001>

<bundles_post_ra>
// kernel: tpu_custom_call.1
= control target key start
LH: loop header
LB: loop body
LE: loop exit
PB: predicated region body
PF: predicated region fallthrough
CT: control target
= control target key end

     0   :  { %10 = vsyncpa [#allocation3], 0  ;;  %s609_s0 = inlined_call_operand.hbm [shape: f32[8,32], index: 0, kind: input, shape index: {}]   ;;  %s610_s1 = inlined_call_operand.hbm [shape: bf16[32,256], index: 1, kind: input, shape index: {}]   ;;  %s611_s2 = inlined_call_operand.vmem [shape: f32[1,256], index: 2, kind: input, shape index: {}]   ;;  %s612_s3 = inlined_call_operand.hbm [shape: bf16[256,128], index: 3, kind: input, shape index: {}]   ;;  %s613_s4 = inlined_call_operand.vmem [shape: f32[1,128], index: 4, kind: input, shape index: {}]   ;;  %s614_s5 = inlined_call_operand.hbm [shape: f32[8,128], index: 5, kind: output, shape index: {}]  }
   0x1   :  { %11 = vsyncpa [#allocation6], 0 }
   0x2   :  { %12 = vsyncpa [#allocation4], 0  ;;  %s516_s18 = smov [#allocation5]   ;;  %s422_s22 = scalar_lea.hbm %s610_s1, 512 }
   0x3   :  { %s28_s19 = sshll.u32 %s516_s18, 4  ;;  %p423_p0 = scmp.ne.s32.totalorder %s610_s1, %s422_s22  ;;  %s29_s19 = int_to_ptr.vmem [resolvable:$true] %s28_s19 }
   0x4   :  { %p426_p1 = scmp.lt.u32.totalorder %s422_s22, %s610_s1 }
   0x6   :  { %p428_p2 = pnand %p426_p1, %p423_p0 }
   0x8   :  { %431 = shalt.err (!%p428_p2)
}
   0x9   :  { %s432_s27 = scalar_lea.vmem %s29_s19, 512  ;;  %p437_p4 = scmp.lt.s32.totalorder %s29_s19, %s29_s19 }
   0xa   :  { %p433_p3 = scmp.ne.s32.totalorder %s29_s19, %s432_s27  ;;  %p438_p5 = scmp.lt.s32.totalorder %s432_s27, %s432_s27 }
   0xc   :  { %p439_p6 = por %p438_p5, %p437_p4 }
   0xe   :  { %p440_p7 = pnand %p439_p6, %p433_p3 }
  0x10   :  { %443 = shalt.err (!%p440_p7)
}
  0x11   :  { %s517_s28 = smov 128   ;;  %s518_s29 = smov 8  }
  0x12   :  { %34 = dma.hbm_to_vmem [thread:$0]  %s610_s1, 512, %s29_s19, [#allocation6], %s517_s28, %s517_s28, %s518_s29  }
  0x13   :  { %s519_s7 = smov [#allocation2]   ;;  %s520_s9 = smov [#allocation7]  }
  0x14   :  { %s19_s8 = sshll.u32 %s519_s7, 4  ;;  %s42_s10 = sshll.u32 %s520_s9, 4  ;;  %s20_s8 = int_to_ptr.vmem [resolvable:$true] %s19_s8  ;;  %s43_s10 = int_to_ptr.vmem [resolvable:$true] %s42_s10 }
  0x15   :  { %s444_s13 = scalar_lea.hbm %s609_s0, 128 }
  0x16   :  { %p445_p8 = scmp.ne.s32.totalorder %s609_s0, %s444_s13  ;;  %p448_p9 = scmp.lt.u32.totalorder %s444_s13, %s609_s0 }
  0x18   :  { %p450_p10 = pnand %p448_p9, %p445_p8 }
  0x1a   :  { %453 = shalt.err (!%p450_p10)
}
  0x1b   :  { %s454_s1 = scalar_lea.vmem %s20_s8, 128  ;;  %p459_p12 = scmp.lt.s32.totalorder %s20_s8, %s20_s8 }
  0x1c   :  { %p455_p11 = scmp.ne.s32.totalorder %s20_s8, %s454_s1  ;;  %p460_p13 = scmp.lt.s32.totalorder %s454_s1, %s454_s1 }
  0x1e   :  { %p461_p0 = por %p460_p13, %p459_p12 }
  0x20   :  { %p462_p1 = pnand %p461_p0, %p455_p11 }
  0x22   :  { %465 = shalt.err (!%p462_p1)
}
  0x23   :  { %22 = dma.hbm_to_vmem [thread:$0]  %s609_s0, 128, %s20_s8, [#allocation3]  }
  0x24   :  { %s466_s22 = scalar_lea.hbm %s612_s3, 2048 }
  0x25   :  { %p467_p2 = scmp.ne.s32.totalorder %s612_s3, %s466_s22  ;;  %p470_p3 = scmp.lt.u32.totalorder %s466_s22, %s612_s3 }
  0x27   :  { %p472_p4 = pnand %p470_p3, %p467_p2 }
  0x29   :  { %475 = shalt.err (!%p472_p4)
}
  0x2a   :  { %s476_s27 = scalar_lea.vmem %s43_s10, 2048  ;;  %p481_p6 = scmp.lt.s32.totalorder %s43_s10, %s43_s10 }
  0x2b   :  { %p477_p5 = scmp.ne.s32.totalorder %s43_s10, %s476_s27  ;;  %p482_p7 = scmp.lt.s32.totalorder %s476_s27, %s476_s27 }
  0x2d   :  { %p483_p8 = por %p482_p7, %p481_p6 }
  0x2f   :  { %p484_p9 = pnand %p483_p8, %p477_p5 }
  0x31   :  { %487 = shalt.err (!%p484_p9)
}
  0x32   :  { %s521_s0 = smov 64   ;;  %s522_s28 = smov 4  }
  0x33   :  { %48 = dma.hbm_to_vmem [thread:$0]  %s612_s3, 2048, %s43_s10, [#allocation6], %s521_s0, %s521_s0, %s522_s28  }
  0x34   :  { %510 = dma.done.wait [#allocation3], 128  }
  0x35   :  { %511 = vsyncadd [#allocation3], 4294967168 }
  0x36   :  { %512 = dma.done.wait [#allocation6], 2560  }
  0x37   :  { %513 = vsyncadd [#allocation6], 4294964736  ;;  %v523_v0 = vmov 0   ;;  %v394_v1 = vld [vmem:[#allocation5 + $0x4] ss:$8 sps:$4 sm:$0xff]   ;;  %v61_v5 = vld [vmem:[#allocation2] sm:$0xff]  ;;  %v69_v23 = vlaneseq }
  0x38   :  { %135 = vmatprep.mubr.bf16.mxu0 %v523_v0  ;;  %v396_v2 = vld [vmem:[#allocation5] ss:$8 sps:$4 sm:$0xff]   ;;  %103 = vmatprep.subr.bf16.mxu0 %v394_v1  ;;  %v397_v3 = vld [vmem:[#allocation5 + $0x14] ss:$8 sps:$4 sm:$0xff]   ;;  %v399_v4 = vld [vmem:[#allocation5 + $0x10] ss:$8 sps:$4 sm:$0xff]   ;;  %v62_v9 = vpack.c.bf16 %v61_v5, %v61_v5 }
  0x39   :  { %104 = vmatpush1.bf16.msra.mxu0 %v396_v2  ;;  %v400_v6 = vld [vmem:[#allocation7 + $0x40] sm:$0xff]   ;;  %v402_v8 = vld [vmem:[#allocation7 + $0x48] sm:$0xff]   ;;  %vm99_vm0 = vcmask 261120   ;;  %v404_v11 = vld [vmem:[#allocation7 + $0x50] sm:$0xff]   ;;  %v70_v24 = vshrl.u32 %v69_v23, 7  ;;  %s524_s8 = smov [#allocation8]  }
  0x3a   :  { %105 = vmatprep.subr.bf16.mxu0 %v397_v3  ;;  %v401_v7 = vld [vmem:[#allocation7] sm:$0xff]   ;;  %363 = vmatprep.subr.bf16.mxu1 %v400_v6  ;;  %v403_v10 = vld [vmem:[#allocation7 + $0x8] sm:$0xff]   ;;  %v405_v12 = vld [vmem:[#allocation7 + $0x10] sm:$0xff]   ;;  %s331_s9 = sshll.u32 %s524_s8, 4  ;;  %s332_s9 = int_to_ptr.vmem [resolvable:$true] %s331_s9 }
  0x3b   :  { %364 = vmatpush3.bf16.msra.mxu1 %v401_v7  ;;  %v406_v13 = vld [vmem:[#allocation7 + $0x58] sm:$0xff]   ;;  %v408_v15 = vld [vmem:[#allocation7 + $0x60] sm:$0xff]   ;;  %v410_v17 = vld [vmem:[#allocation7 + $0x68] sm:$0xff]   ;;  %v71_v25 = vsub.s32 0, %v70_v24  ;;  %v75_v27 = vsub.s32 1, %v70_v24  ;;  %s488_s10 = scalar_lea.vmem %s332_s9, 128  ;;  %p493_p11 = scmp.lt.s32.totalorder %s332_s9, %s332_s9 }
  0x3c   :  { %365 = vmatprep.subr.bf16.mxu1 %v402_v8  ;;  %v407_v14 = vld [vmem:[#allocation7 + $0x18] sm:$0xff]   ;;  %v409_v16 = vld [vmem:[#allocation7 + $0x20] sm:$0xff]   ;;  %v411_v18 = vld [vmem:[#allocation7 + $0x28] sm:$0xff]   ;;  %p489_p10 = scmp.ne.s32.totalorder %s332_s9, %s488_s10  ;;  %p494_p12 = scmp.lt.s32.totalorder %s488_s10, %s488_s10 }
  0x3d   :  { %106 = vmatpush1.bf16.msra.mxu0 %v399_v4  ;;  %v412_v19 = vld [vmem:[#allocation7 + $0x70] sm:$0xff]   ;;  %v414_v21 = vld [vmem:[#allocation7 + $0x78] sm:$0xff]  }
  0x3e   :  { %v413_v20 = vld [vmem:[#allocation7 + $0x30] sm:$0xff]   ;;  %v415_v22 = vld [vmem:[#allocation7 + $0x38] sm:$0xff]   ;;  %p495_p13 = por %p494_p12, %p493_p11 }
  0x3f   :  { %366 = vmatpush3.bf16.msra.mxu1 %v403_v10  ;;  %v67_v26 = vld [vmem:[%s611_s2] sm:$0x3] }
  0x40   :  { %345 = vmatmul.mubr.msk.bf16.vlgmr.msra.gmra.mrb[0].mxu0 %vm99_vm0, %v62_v9  ;;  %367 = vmatprep.subr.bf16.mxu1 %v404_v11  ;;  %v72_v28 = vrot.slane %v67_v26, %v71_v25  ;;  %v76_v29 = vrot.slane %v67_v26, %v75_v27  ;;  %v346_v41 = vld [vmem:[%s613_s4] ss:$0 sm:$0xff]  ;;  %p496_p0 = pnand %p495_p13, %p489_p10 }
  0x43   :  { %368 = vmatpush3.bf16.msra.mxu1 %v405_v12 }
  0x44   :  { %369 = vmatprep.subr.bf16.mxu1 %v406_v13 }
  0x47   :  { %370 = vmatpush3.bf16.msra.mxu1 %v407_v14 }
  0x48   :  { %371 = vmatprep.subr.bf16.mxu1 %v408_v15 }
  0x4b   :  { %372 = vmatpush3.bf16.msra.mxu1 %v409_v16 }
  0x4c   :  { %373 = vmatprep.subr.bf16.mxu1 %v410_v17 }
  0x4f   :  { %374 = vmatpush3.bf16.msra.mxu1 %v411_v18 }
  0x50   :  { %375 = vmatprep.subr.bf16.mxu1 %v412_v19 }
  0x53   :  { %376 = vmatpush3.bf16.msra.mxu1 %v413_v20 }
  0x54   :  { %377 = vmatprep.subr.bf16.mxu1 %v414_v21 }
  0x57   :  { %378 = vmatpush3.bf16.msra.mxu1 %v415_v22 }
 0x113   :  { %v137_v30 = vpop.f32.mrb[0].mxu0 }
 0x114   :  { %v138_v31 = vadd.f32 %v137_v30, %v72_v28  ;;  %v139_v32 = vpop.f32.mrb[1].mxu0 }
 0x115   :  { %v140_v33 = vadd.f32 %v139_v32, %v76_v29  ;;  %v141_v34 = vpop.f32.mrb[2].mxu0 }
 0x116   :  { %416 = vtanh.f32 %v138_v31  ;;  %v142_v35 = vpop.f32.mrb[3].mxu0 }
 0x117   :  { %418 = vtanh.f32 %v140_v33 }
 0x120   :  { %v417_v36 = vpop.eup %416 }
 0x121   :  { %v419_v37 = vpop.eup %418  ;;  %v146_v39 = vpack.c.bf16 %v417_v36, %v417_v36 }
 0x122   :  { %v147_v38 = vpack.c.bf16 %v419_v37, %v419_v37 }
 0x124   :  { %315 = vmatprep.mubr.bf16.mxu1 %v147_v38 }
 0x125   :  { %316 = vmatmul.mubr.bf16.vlgmr.msra.gmra.mrb[0].mxu1 %v146_v39 }
 0x1f8   :  { %v379_v40 = vpop.f32.mrb[0].mxu1 }
 0x1f9   :  { %v380_v42 = vpop.f32.mrb[1].mxu1 }
 0x1fa   :  { %v381_v43 = vadd.f32 %v380_v42, %v379_v40  ;;  %v382_v44 = vpop.f32.mrb[2].mxu1 }
 0x1fb   :  { %v383_v45 = vpop.f32.mrb[3].mxu1 }
 0x1fc   :  { %v318_v46 = vadd.f32 %v381_v43, %v346_v41 }
 0x1fe   :  { %420 = vtanh.f32 %v318_v46 }
 0x208   :  { %v421_v47 = vpop.eup %420 }
 0x209   :  { %324 = vst [vmem:[#allocation8] sm:$0xff] %v421_v47 }
 0x20a   :  { %499 = shalt.err (!%p496_p0)
}
 0x20b   :  { %s500_s12 = scalar_lea.hbm %s614_s5, 128 }
 0x20c   :  { %p501_p1 = scmp.ne.s32.totalorder %s614_s5, %s500_s12  ;;  %p504_p2 = scmp.lt.u32.totalorder %s500_s12, %s614_s5 }
 0x20e   :  { %p506_p3 = pnand %p504_p2, %p501_p1 }
 0x210   :  { %509 = shalt.err (!%p506_p3)
}
 0x211   :  { %334 = dma.vmem_to_hbm [thread:$0]  %s332_s9, 128, %s614_s5, [#allocation4]  }
 0x212   :  { %514 = dma.done.wait [#allocation4], 128  }
 0x213   :  { %515 = vsyncadd [#allocation4], 4294967168 }
 0x214   :  { %338 = vsyncpa [#allocation3], 1 }
 0x215   :  { %339 = vsyncpa [#allocation6], 1 }
 0x216   :  { %340 = vsyncpa [#allocation4], 1 }

</bundles_post_ra>
